<compile_context>
chip_gen: v7x
topology: tpu7x:2x2x1
jax: 0.10.0
libtpu: 0.0.40
codegen_flags: <defaults>
</compile_context>

<pallas_src>
import numpy as np
import jax
import jax.numpy as jnp
from jax.experimental import pallas as pl
from jax.experimental.pallas import tpu as pltpu

K_S = 3        # the PyTorch module reads a global `k_s`; fixed to 3 here
EPS = 1e-6
NPARAM = 44    # 27 dw taps + bdw + lnw + lnb + 4*w1 + 4*b1 + 4*w2 + b2 + gamma
NMASK = 10     # 2 d-axis masks + 8 combined h/w masks
_SQRT_HALF = 0.7071067811865476


# --------------------------------------------------------------------------
# pltpu.roll direction probe
# --------------------------------------------------------------------------
_ROLL_LIKE_JNP = None


def _roll_is_jnp_convention():
    """The rotation direction of pltpu.roll is load-bearing for the conv tap
    offsets.  Probe it once with a 1-vreg kernel so the tap indexing is robust
    across Pallas versions / interpret mode (jnp.roll convention:
    out[i] = x[i - shift])."""
    global _ROLL_LIKE_JNP
    if _ROLL_LIKE_JNP is None:
        def probe(x_ref, o_ref):
            o_ref[...] = pltpu.roll(x_ref[...], shift=1, axis=1)

        x = jnp.broadcast_to(jnp.arange(128, dtype=jnp.int32), (8, 128))
        r = pl.pallas_call(
            probe, out_shape=jax.ShapeDtypeStruct((8, 128), jnp.int32))(x)
        _ROLL_LIKE_JNP = (int(r[0, 1]) == 0)
    return _ROLL_LIKE_JNP


# --------------------------------------------------------------------------
# in-kernel math helpers
# --------------------------------------------------------------------------
def _erf(u):
    # Abramowitz & Stegun 7.1.26, |err| <= 1.5e-7.  The rational term uses the
    # EUP approximate reciprocal plus one Newton step (rel. err ~1e-8), so GELU
    # stays accurate even for trained (non-tiny) gamma while the divide cost
    # stays off the VALU; exp also runs on the EUP.
    a1, a2, a3, a4, a5 = (0.254829592, -0.284496736, 1.421413741,
                          -1.453152027, 1.061405429)
    p = 0.3275911
    au = jnp.abs(u)
    d = 1.0 + p * au
    t0 = pl.reciprocal(d, approx=True)          # EUP
    t = t0 * (2.0 - d * t0)                     # one Newton refinement step
    poly = ((((a5 * t + a4) * t + a3) * t + a2) * t + a1) * t
    erf_abs = 1.0 - poly * jnp.exp(-au * au)    # exp on EUP
    return jnp.where(u >= 0.0, erf_abs, -erf_abs)


def _gelu_exact(x):
    return 0.5 * x * (1.0 + _erf(x * _SQRT_HALF))


# --------------------------------------------------------------------------
# fused kernel
# --------------------------------------------------------------------------
def _make_kernel(D, H, W, C, S, roll_like_jnp=True):
    HW = H * W

    def sh(off):
        # shift such that pltpu.roll(x, sh(off), axis=1)[s] == x[(s + off) % S]
        return (-off) % S if roll_like_jnp else off % S

    def kernel(x_ref, pp_ref, mask_ref, out_ref):
        x = x_ref[0]          # (C, S): conv input and residual (lane-dense)
        pp = pp_ref[...]      # (C, 44): packed per-channel parameters

        # ---- depthwise 3x3x3 conv (deformable conv with exactly-zero offsets) ----
        # Separable shift form.  xd[kd][s] = x[s + kd*HW] * d_mask(s, kd); the
        # d-mask commutes with the later (kh,kw) roll wherever the combined
        # h/w mask is nonzero, so the composition reproduces zero padding.
        xd_m = pltpu.roll(x, shift=sh(-HW), axis=1) * mask_ref[0:1, :]   # kd = -1
        xd_p = pltpu.roll(x, shift=sh(+HW), axis=1) * mask_ref[1:2, :]   # kd = +1
        xd = (xd_m, x, xd_p)

        y = None
        mrow = 2
        for kh in (-1, 0, 1):
            for kw in (-1, 0, 1):
                # packed tap column for (kd, kh, kw) is 9*(kd+1) + 3*(kh+1) + (kw+1)
                c0 = 3 * (kh + 1) + (kw + 1)
                zs = (xd[0] * pp[:, c0:c0 + 1]
                      + xd[1] * pp[:, 9 + c0:10 + c0]
                      + xd[2] * pp[:, 18 + c0:19 + c0])
                off = kh * W + kw
                if off == 0:
                    contrib = zs                                   # center column
                else:
                    # rolled[s] = zs[s + off]; the combined h/w boundary mask
                    # zeroes wrapped lanes (and any stale d-mask value with them).
                    contrib = (pltpu.roll(zs, shift=sh(off), axis=1)
                               * mask_ref[mrow:mrow + 1, :])
                    mrow += 1
                y = contrib if y is None else y + contrib
        y = y + pp[:, 27:28]                                       # depthwise bias

        # ---- LayerNorm over channels (sublane axis), one-pass biased stats ----
        mu = jnp.mean(y, axis=0, keepdims=True)                    # (1, S)
        msq = jnp.mean(y * y, axis=0, keepdims=True)
        var = jnp.maximum(msq - mu * mu, 0.0)
        rstd = jax.lax.rsqrt(var + EPS)                            # EUP
        yln = (y - mu) * rstd * pp[:, 28:29] + pp[:, 29:30]

        # ---- grouped 1x1 convs dim -> 4*dim -> dim with exact GELU between ----
        # out[c] = b2[c] + sum_j w2[j,c] * gelu(w1[j,c]*yln[c] + b1[j,c])
        z = None
        for j in range(4):
            h = yln * pp[:, 30 + j:31 + j] + pp[:, 34 + j:35 + j]
            term = _gelu_exact(h) * pp[:, 38 + j:39 + j]
            z = term if z is None else z + term
        z = z + pp[:, 42:43]

        # ---- layer scale + residual (drop_path = 0 -> identity) ----
        out_ref[0] = x + pp[:, 43:44] * z

    return kernel


# --------------------------------------------------------------------------
# host-side helpers
# --------------------------------------------------------------------------
def _make_factored_masks(D, H, W):
    """(10, D*H*W) f32 boundary masks.
    Rows 0/1: d-axis validity for kd = -1 / +1.
    Rows 2..9: combined h/w validity for the 8 non-center (kh, kw) taps,
    in the same loop order as the kernel."""
    d, h, w = np.meshgrid(np.arange(D), np.arange(H), np.arange(W), indexing="ij")
    d, h, w = d.ravel(), h.ravel(), w.ravel()
    rows = [(d - 1 >= 0), (d + 1 <= D - 1)]
    for kh in (-1, 0, 1):
        for kw in (-1, 0, 1):
            if kh == 0 and kw == 0:
                continue
            rows.append((0 <= h + kh) & (h + kh < H) &
                        (0 <= w + kw) & (w + kw < W))
    return jnp.asarray(np.stack(rows, axis=0).astype(np.float32))


def pack_params(params):
    """Pack all per-channel parameters into one (C, 44) array (single DMA)."""
    wdw = params["wdw"]                       # (K, K, K, C)
    K = wdw.shape[0]
    cols = [wdw[kd, kh, kw] for kd in range(K) for kh in range(K) for kw in range(K)]
    cols += [params["bdw"], params["lnw"], params["lnb"]]
    cols += [params["w1"][j] for j in range(4)]
    cols += [params["b1"][j] for j in range(4)]
    cols += [params["w2"][j] for j in range(4)]
    cols += [params["b2"], params["gamma"]]
    return jnp.stack(cols, axis=1).astype(jnp.float32)   # (C, 44)


def deformux_block_forward(x_ncdhw, params):
    """x_ncdhw: (N, C, D, H, W) float32 — same layout as the PyTorch module."""
    N, C, D, H, W = x_ncdhw.shape
    S = D * H * W
    x_flat = x_ncdhw.reshape(N, C, S)            # free reshape, no transpose/pad
    pp = pack_params(params)                     # (C, 44)
    masks = _make_factored_masks(D, H, W)        # (10, S)

    kernel = _make_kernel(D, H, W, C, S, roll_like_jnp=_roll_is_jnp_convention())
    out_flat = pl.pallas_call(
        kernel,
        out_shape=jax.ShapeDtypeStruct((N, C, S), jnp.float32),
        grid_spec=pltpu.PrefetchScalarGridSpec(
            num_scalar_prefetch=0,
            grid=(N,),
            in_specs=[
                pl.BlockSpec((1, C, S), lambda b: (b, 0, 0)),       # activations
                pl.BlockSpec((C, NPARAM), lambda b: (0, 0)),        # packed params
                pl.BlockSpec((NMASK, S), lambda b: (0, 0)),         # boundary masks
            ],
            out_specs=pl.BlockSpec((1, C, S), lambda b: (b, 0, 0)),
        ),
        compiler_params=pltpu.CompilerParams(
            dimension_semantics=("parallel",)),
    )(x_flat, pp, masks)
    return out_flat.reshape(N, C, D, H, W)


def init_params(key, dim, k, layer_scale_init_value=1e-6):
    """Deterministic synthetic parameters matching the module's shapes/init."""
    keys = jax.random.split(key, 6)
    # DeformConv weight: (dim, 1, k, k, k), kaiming_uniform(a=sqrt(5))
    fan_dw = 1 * k * k * k
    bound_dw = 1.0 / np.sqrt(fan_dw)
    wdw_torch = jax.random.uniform(keys[0], (dim, 1, k, k, k), jnp.float32,
                                   -bound_dw, bound_dw)
    bdw = jax.random.uniform(keys[1], (dim,), jnp.float32, -bound_dw, bound_dw)
    # conv_offset weight/bias are zero-initialized in the module -> offsets == 0.
    lnw = jnp.ones((dim,), jnp.float32)
    lnb = jnp.zeros((dim,), jnp.float32)
    # pwconv1: Conv3d(dim, 4*dim, 1, groups=dim): weight (4*dim, 1, 1, 1, 1), fan_in=1
    w1 = jax.random.uniform(keys[2], (4 * dim,), jnp.float32, -1.0, 1.0)
    b1 = jax.random.uniform(keys[3], (4 * dim,), jnp.float32, -1.0, 1.0)
    # pwconv2: Conv3d(4*dim, dim, 1, groups=dim): weight (dim, 4, 1, 1, 1), fan_in=4
    bound2 = 1.0 / np.sqrt(4.0)
    w2 = jax.random.uniform(keys[4], (dim, 4), jnp.float32, -bound2, bound2)
    b2 = jax.random.uniform(keys[5], (dim,), jnp.float32, -bound2, bound2)
    gamma = layer_scale_init_value * jnp.ones((dim,), jnp.float32)

    return dict(
        wdw=jnp.transpose(wdw_torch[:, 0], (1, 2, 3, 0)),    # (K, K, K, C)
        bdw=bdw, lnw=lnw, lnb=lnb,
        w1=jnp.transpose(w1.reshape(dim, 4), (1, 0)),         # (4, C): w1[j, c] = flat[4c+j]
        b1=jnp.transpose(b1.reshape(dim, 4), (1, 0)),
        w2=jnp.transpose(w2, (1, 0)),                         # (4, C): w2[j, c]
        b2=b2, gamma=gamma,
    )


def reference_forward(x_cl, params):
    """Pure-JAX reference, channels-last input (N, D, H, W, C)."""
    C = x_cl.shape[-1]
    rhs = params["wdw"][..., None, :]  # (K, K, K, 1, C)
    y = jax.lax.conv_general_dilated(
        x_cl, rhs, window_strides=(1, 1, 1), padding="SAME",
        dimension_numbers=("NDHWC", "DHWIO", "NDHWC"),
        feature_group_count=C, precision=jax.lax.Precision.HIGHEST)
    y = y + params["bdw"]
    mu = y.mean(-1, keepdims=True)
    var = ((y - mu) ** 2).mean(-1, keepdims=True)
    yln = (y - mu) / jnp.sqrt(var + EPS) * params["lnw"] + params["lnb"]
    z = jnp.broadcast_to(params["b2"], yln.shape)
    for j in range(4):
        h = yln * params["w1"][j] + params["b1"][j]
        z = z + params["w2"][j] * jax.nn.gelu(h, approximate=False)
    return x_cl + params["gamma"] * z


if __name__ == "__main__":
    # PyTorch layout: (N, C, D, H, W) = (2, 8, 8, 8, 8); dim = 8, k_s = 3.
    N, C, D, H, W = 2, 8, 8, 8, 8
    key = jax.random.PRNGKey(0)
    kx, kp = jax.random.split(key)
    x = jax.random.normal(kx, (N, C, D, H, W), jnp.float32)   # NCDHW, as the module sees it
    # layer_scale_init_value is a module hyperparameter; 0.1 (instead of the
    # 1e-6 default) keeps the non-residual path numerically observable: with
    # gamma = 1e-6 the block's delta is smaller than one f32 ulp of the
    # residual, so any comparison of (out - x) after the residual add is
    # ill-conditioned (this is what tripped the previous delta check).
    params = init_params(kp, C, K_S, layer_scale_init_value=0.1)

    out = jax.block_until_ready(deformux_block_forward(x, params))

    # Pure-JAX reference (channels-last), transposed back to NCDHW for comparison.
    ref = jnp.transpose(
        reference_forward(jnp.transpose(x, (0, 2, 3, 4, 1)), params),
        (0, 4, 1, 2, 3))

    assert out.shape == x.shape
    out_np, ref_np, x_np = np.asarray(out), np.asarray(ref), np.asarray(x)
    assert np.allclose(out_np, ref_np, rtol=1e-4, atol=1e-5), (
        float(np.max(np.abs(out_np - ref_np))))
    # Non-residual contribution: validates the conv / LN / MLP / layer-scale
    # path.  atol budgets for f32 residual-add rounding (~1 ulp of x) plus
    # the erf polynomial / summation-order differences.
    assert np.allclose(out_np - x_np, ref_np - x_np, rtol=2e-3, atol=1e-5), (
        float(np.max(np.abs((out_np - x_np) - (ref_np - x_np)))))
    print("KERNEL_OK")
</pallas_src>

<mosaic_0001>
module attributes {stable_mosaic.version = 11 : i64} {
  func.func @probe(%arg0: memref<8x128xi32, #tpu.memory_space<vmem>>, %arg1: memref<8x128xi32, #tpu.memory_space<vmem>>) attributes {dimension_semantics = [], scalar_prefetch = 0 : i64, scratch_operands = 0 : i64, tpu.core_type = #tpu.core_type<tc>} {
    %c0 = arith.constant 0 : index
    %c0_0 = arith.constant 0 : index
    %0 = vector.load %arg0[%c0, %c0_0] : memref<8x128xi32, #tpu.memory_space<vmem>>, vector<8x128xi32>
    %c1_i32 = arith.constant 1 : i32
    %1 = tpu.dynamic_rotate %0 by %c1_i32 dim 1 : vector<8x128xi32>, i32 -> vector<8x128xi32>
    %c0_1 = arith.constant 0 : index
    %c0_2 = arith.constant 0 : index
    %2 = vector.load %arg1[%c0_1, %c0_2] : memref<8x128xi32, #tpu.memory_space<vmem>>, vector<8x128xi32>
    tpu.vector_store %arg1[%c0_1, %c0_2], %1 {strides = array<i32>} : memref<8x128xi32, #tpu.memory_space<vmem>>, vector<8x128xi32>,
    return
  }
}

</mosaic_0001>

<bundles_post_ra>
// kernel: tpu_custom_call.1
= control target key start
LH: loop header
LB: loop body
LE: loop exit
PB: predicated region body
PF: predicated region fallthrough
CT: control target
= control target key end

     0   :  { %6 = vsyncpa [#allocation3], 0  ;;  %s128_s0 = inlined_call_operand.hbm [shape: s32[8,128], index: 0, kind: input, shape index: {}]   ;;  %s129_s1 = inlined_call_operand.hbm [shape: s32[8,128], index: 1, kind: output, shape index: {}]  }
   0x1   :  { %7 = vsyncpa [#allocation4], 0  ;;  %s91_s6 = smov [#allocation2]   ;;  %s43_s10 = scalar_lea.hbm %s128_s0, 128 }
   0x2   :  { %s14_s7 = sshll.u32 %s91_s6, 4  ;;  %p44_p0 = scmp.ne.s32.totalorder %s128_s0, %s43_s10  ;;  %s15_s7 = int_to_ptr.vmem [resolvable:$true] %s14_s7 }
   0x3   :  { %p47_p1 = scmp.lt.u32.totalorder %s43_s10, %s128_s0 }
   0x5   :  { %p49_p2 = pnand %p47_p1, %p44_p0 }
   0x7   :  { %52 = shalt.err (!%p49_p2)
}
   0x8   :  { %s53_s15 = scalar_lea.vmem %s15_s7, 128  ;;  %p58_p4 = scmp.lt.s32.totalorder %s15_s7, %s15_s7 }
   0x9   :  { %p54_p3 = scmp.ne.s32.totalorder %s15_s7, %s53_s15  ;;  %p59_p5 = scmp.lt.s32.totalorder %s53_s15, %s53_s15 }
   0xb   :  { %p60_p6 = por %p59_p5, %p58_p4 }
   0xd   :  { %p61_p7 = pnand %p60_p6, %p54_p3 }
   0xf   :  { %64 = shalt.err (!%p61_p7)
}
  0x10   :  { %17 = dma.hbm_to_vmem [thread:$0]  %s128_s0, 128, %s15_s7, [#allocation3]  }
  0x11   :  { %87 = dma.done.wait [#allocation3], 128  }
  0x12   :  { %88 = vsyncadd [#allocation3], 4294967168  ;;  %v21_v0 = vld [vmem:[#allocation2] sm:$0xff]  ;;  %s92_s18 = smov 1   ;;  %s93_s19 = smov [#allocation5]  }
  0x13   :  { %22 = vrot.lane.b32.xlu0 %v21_v0, %s92_s18  ;;  %s31_s20 = sshll.u32 %s93_s19, 4  ;;  %s32_s20 = int_to_ptr.vmem [resolvable:$true] %s31_s20 }
  0x14   :  { %s65_s21 = scalar_lea.vmem %s32_s20, 128  ;;  %p70_p9 = scmp.lt.s32.totalorder %s32_s20, %s32_s20 }
  0x15   :  { %p66_p8 = scmp.ne.s32.totalorder %s32_s20, %s65_s21  ;;  %p71_p10 = scmp.lt.s32.totalorder %s65_s21, %s65_s21 }
  0x17   :  { %p72_p11 = por %p71_p10, %p70_p9 }
  0x19   :  { %p73_p12 = pnand %p72_p11, %p66_p8 }
  0x85   :  { %v23_v1 = vpop.permute.xlu0 %22 }
  0x86   :  { %24 = vst [vmem:[#allocation5] sm:$0xff] %v23_v1 }
  0x87   :  { %76 = shalt.err (!%p73_p12)
}
  0x88   :  { %s77_s0 = scalar_lea.hbm %s129_s1, 128 }
  0x89   :  { %p78_p13 = scmp.ne.s32.totalorder %s129_s1, %s77_s0  ;;  %p81_p0 = scmp.lt.u32.totalorder %s77_s0, %s129_s1 }
  0x8b   :  { %p83_p1 = pnand %p81_p0, %p78_p13 }
  0x8d   :  { %86 = shalt.err (!%p83_p1)
}
  0x8e   :  { %34 = dma.vmem_to_hbm [thread:$0]  %s32_s20, 128, %s129_s1, [#allocation4]  }
  0x8f   :  { %89 = dma.done.wait [#allocation4], 128  }
  0x90   :  { %90 = vsyncadd [#allocation4], 4294967168 }
  0x91   :  { %38 = vsyncpa [#allocation3], 1 }
  0x92   :  { %39 = vsyncpa [#allocation4], 1 }

</bundles_post_ra>
